<compile_context>
chip_gen: v6e
topology: v6e:2x2x1
jax: 0.10.0
libtpu: 0.0.40
codegen_flags: <defaults>
</compile_context>

<pallas_src>
import jax
import jax.numpy as jnp
from jax.experimental import pallas as pl
from jax.experimental.pallas import tpu as pltpu


def _pick_row_tile(B, H, W, itemsize, vmem_budget_bytes=16 * 1024 * 1024):
    """Largest H tile s.t. 2 inputs x 2 pipeline buffers fit the VMEM budget."""
    per_row = max(1, B * 2 * W * itemsize)          # bytes per H row per input block
    max_rows = max(8, vmem_budget_bytes // (4 * per_row))
    for th in (1024, 512, 256, 128, 64, 32, 16, 8):
        if th <= max_rows and H % th == 0:
            return th
    # Awkward H (not divisible by 8): take the full extent as one block.
    return H


def diffusion_loss(predicted_diffusion, target_diffusion, *, row_tile=None,
                   num_core_splits=2):
    """Pallas TPU implementation of DiffusionLoss.forward."""
    assert predicted_diffusion.shape == target_diffusion.shape
    assert predicted_diffusion.ndim == 4 and predicted_diffusion.shape[1] >= 2
    B, C, H, W = predicted_diffusion.shape
    itemsize = max(jnp.dtype(predicted_diffusion.dtype).itemsize,
                   jnp.dtype(target_diffusion.dtype).itemsize)

    if row_tile is None:
        row_tile = _pick_row_tile(B, H, W, itemsize)
    assert H % row_tile == 0 and (row_tile % 8 == 0 or row_tile == H), (
        "row_tile must divide H and be a multiple of 8 (or equal H)")
    n_h_tiles = H // row_tile

    # Optional leading parallel axis so a 2-TC chip (v7x) streams half the rows
    # per core; falls back to a single split when it does not divide evenly.
    n_splits = (num_core_splits
                if (num_core_splits > 1 and n_h_tiles % num_core_splits == 0)
                else 1)
    n_h_per_split = n_h_tiles // n_splits

    inv_pitch = 1.0 / float(B * B * H * W)   # pitches_loss denominator
    inv_mask = 1.0 / float(B * H * W)        # mask_loss denominator

    def kernel(pred_ref, targ_ref, out_ref, acc_ref):
        h = pl.program_id(1)

        @pl.when(h == 0)
        def _init():
            acc_ref[0] = jnp.float32(0.0)
            acc_ref[1] = jnp.float32(0.0)

        # Channel views straight from the refs (no full-block load, no unused
        # channels in vregs); cast in-vreg, DMA stays in the source dtype.
        pm = pred_ref[:, 0, :, :].astype(jnp.float32)   # [B, TH, W]
        pp = pred_ref[:, 1, :, :].astype(jnp.float32)
        tm = targ_ref[:, 0, :, :].astype(jnp.float32)
        tp = targ_ref[:, 1, :, :].astype(jnp.float32)

        dp = pp - tp
        dp2_sum = jnp.sum(dp * dp, axis=0)              # [TH, W]  (VALU adds over B)
        tm2_sum = jnp.sum(tm * tm, axis=0)              # [TH, W]
        md = pm - tm

        acc_ref[0] += jnp.sum(dp2_sum * tm2_sum)        # one XLU reduce per tile
        acc_ref[1] += jnp.sum(md * md)

        @pl.when(h == pl.num_programs(1) - 1)
        def _finalize():
            out_ref[0, 0] = (acc_ref[0] * jnp.float32(inv_pitch)
                             + acc_ref[1] * jnp.float32(inv_mask))

    def in_index_map(c, h):
        # Only the first block (channels 0..1) along C is ever fetched.
        return (0, 0, c * n_h_per_split + h, 0)

    in_spec = pl.BlockSpec((B, 2, row_tile, W), in_index_map)

    bytes_accessed = 2 * B * 2 * H * W * itemsize + n_splits * 4
    cost = pl.CostEstimate(flops=int(10 * B * H * W),
                           transcendentals=0,
                           bytes_accessed=int(bytes_accessed))

    partials = pl.pallas_call(
        kernel,
        out_shape=jax.ShapeDtypeStruct((n_splits, 1), jnp.float32),
        grid=(n_splits, n_h_per_split),
        in_specs=[in_spec, in_spec],
        out_specs=pl.BlockSpec((1, 1), lambda c, h: (c, 0),
                               memory_space=pltpu.SMEM),
        scratch_shapes=[pltpu.SMEM((2,), jnp.float32)],
        compiler_params=pltpu.CompilerParams(
            dimension_semantics=("parallel", "arbitrary"),
            vmem_limit_bytes=32 * 1024 * 1024),
        cost_estimate=cost,
    )(predicted_diffusion, target_diffusion)

    if n_splits > 1:
        return jnp.sum(partials)
    return partials[0, 0]


def diffusion_loss_ref(pred, targ):
    """Plain-JAX reference reproducing the PyTorch broadcasting literally."""
    pred = pred.astype(jnp.float32)
    targ = targ.astype(jnp.float32)
    pm, pp = pred[:, 0], pred[:, 1]
    tm, tp = targ[:, 0], targ[:, 1]
    masked = pp[None, :, :, :] * tm[:, None, :, :]          # [B, B, H, W]
    tmasked = tp[None, :, :, :] * tm[:, None, :, :]         # [B, B, H, W]
    pitches_diff = masked - tmasked
    mask_diff = pm - tm
    return jnp.mean(jnp.square(pitches_diff)) + jnp.mean(jnp.square(mask_diff))


if __name__ == "__main__":
    key = jax.random.PRNGKey(0)

    def run_case(B, C, H, W, dtype, row_tile=None, seed=0):
        k1, k2 = jax.random.split(jax.random.fold_in(key, seed))
        pred = jax.random.normal(k1, (B, C, H, W), dtype=jnp.float32).astype(dtype)
        targ = jax.random.normal(k2, (B, C, H, W), dtype=jnp.float32).astype(dtype)
        got = jax.block_until_ready(diffusion_loss(pred, targ, row_tile=row_tile))
        want = jax.block_until_ready(diffusion_loss_ref(pred, targ))
        assert jnp.allclose(got, want, rtol=1e-4, atol=1e-5), (dtype, got, want)

    # Extra channels present but never DMA'd (BlockSpec carries only C=0:2).
    run_case(2, 4, 16, 128, jnp.float32, seed=0)
    # Multi-tile grid + 2-way core split + SMEM scalar accumulation path.
    run_case(2, 2, 32, 128, jnp.float32, row_tile=8, seed=1)
    # Narrow-dtype input: DMA'd as bf16, cast in-vreg inside the kernel.
    run_case(2, 4, 16, 128, jnp.bfloat16, seed=2)

    print("KERNEL_OK")
</pallas_src>

<mosaic_0001>
module attributes {stable_mosaic.version = 11 : i64} {
  func.func @kernel(%arg0: i32, %arg1: i32, %arg2: memref<2x2x16x128xf32, #tpu.memory_space<vmem>>, %arg3: memref<2x2x16x128xf32, #tpu.memory_space<vmem>>, %arg4: memref<1x1xf32, #tpu.memory_space<smem>>, %arg5: memref<2xf32, #tpu.memory_space<smem>>) attributes {dimension_semantics = [#tpu.dimension_semantics<parallel>, #tpu.dimension_semantics<arbitrary>], iteration_bounds = array<i64: 1, 1>, scalar_prefetch = 0 : i64, scratch_operands = 1 : i64, tpu.core_type = #tpu.core_type<tc>, window_params = [{transform_indices = @transform_0, window_bounds = array<i64: 2, 2, 16, 128>}, {transform_indices = @transform_1, window_bounds = array<i64: 2, 2, 16, 128>}, {transform_indices = @transform_2, window_bounds = array<i64: 1, 1>}]} {
    %c0_i32 = arith.constant 0 : i32
    %0 = arith.cmpi eq, %arg1, %c0_i32 : i32
    %1 = arith.extui %0 : i1 to i32
    %c0_i32_0 = arith.constant 0 : i32
    %2 = arith.cmpi ne, %1, %c0_i32_0 : i32
    scf.if %2 {
      %cst_24 = arith.constant 0.000000e+00 : f32
      %c0_25 = arith.constant 0 : index
      %36 = memref.load %arg5[%c0_25] : memref<2xf32, #tpu.memory_space<smem>>
      memref.store %cst_24, %arg5[%c0_25] : memref<2xf32, #tpu.memory_space<smem>>
      %cst_26 = arith.constant 0.000000e+00 : f32
      %c1_27 = arith.constant 1 : index
      %37 = memref.load %arg5[%c1_27] : memref<2xf32, #tpu.memory_space<smem>>
      memref.store %cst_26, %arg5[%c1_27] : memref<2xf32, #tpu.memory_space<smem>>
    } else {
    }
    %c0 = arith.constant 0 : index
    %c0_1 = arith.constant 0 : index
    %c0_2 = arith.constant 0 : index
    %c0_3 = arith.constant 0 : index
    %3 = vector.load %arg2[%c0, %c0_1, %c0_2, %c0_3] : memref<2x2x16x128xf32, #tpu.memory_space<vmem>>, vector<2x1x16x128xf32>
    %4 = vector.shape_cast %3 : vector<2x1x16x128xf32> to vector<2x16x128xf32>
    %c0_4 = arith.constant 0 : index
    %c1 = arith.constant 1 : index
    %c0_5 = arith.constant 0 : index
    %c0_6 = arith.constant 0 : index
    %5 = vector.load %arg2[%c0_4, %c1, %c0_5, %c0_6] : memref<2x2x16x128xf32, #tpu.memory_space<vmem>>, vector<2x1x16x128xf32>
    %6 = vector.shape_cast %5 : vector<2x1x16x128xf32> to vector<2x16x128xf32>
    %c0_7 = arith.constant 0 : index
    %c0_8 = arith.constant 0 : index
    %c0_9 = arith.constant 0 : index
    %c0_10 = arith.constant 0 : index
    %7 = vector.load %arg3[%c0_7, %c0_8, %c0_9, %c0_10] : memref<2x2x16x128xf32, #tpu.memory_space<vmem>>, vector<2x1x16x128xf32>
    %8 = vector.shape_cast %7 : vector<2x1x16x128xf32> to vector<2x16x128xf32>
    %c0_11 = arith.constant 0 : index
    %c1_12 = arith.constant 1 : index
    %c0_13 = arith.constant 0 : index
    %c0_14 = arith.constant 0 : index
    %9 = vector.load %arg3[%c0_11, %c1_12, %c0_13, %c0_14] : memref<2x2x16x128xf32, #tpu.memory_space<vmem>>, vector<2x1x16x128xf32>
    %10 = vector.shape_cast %9 : vector<2x1x16x128xf32> to vector<2x16x128xf32>
    %11 = arith.subf %6, %10 : vector<2x16x128xf32>
    %12 = arith.mulf %11, %11 : vector<2x16x128xf32>
    %cst = arith.constant dense<0.000000e+00> : vector<16x128xf32>
    %13 = vector.multi_reduction <add>, %12, %cst [0] : vector<2x16x128xf32> to vector<16x128xf32>
    %14 = arith.mulf %8, %8 : vector<2x16x128xf32>
    %cst_15 = arith.constant dense<0.000000e+00> : vector<16x128xf32>
    %15 = vector.multi_reduction <add>, %14, %cst_15 [0] : vector<2x16x128xf32> to vector<16x128xf32>
    %16 = arith.subf %4, %8 : vector<2x16x128xf32>
    %c0_16 = arith.constant 0 : index
    %17 = memref.load %arg5[%c0_16] : memref<2xf32, #tpu.memory_space<smem>>
    %18 = arith.mulf %13, %15 : vector<16x128xf32>
    %19 = vector.shape_cast %18 : vector<16x128xf32> to vector<1x16x128xf32>
    %cst_17 = arith.constant dense<0.000000e+00> : vector<1xf32>
    %20 = vector.multi_reduction <add>, %19, %cst_17 [1, 2] : vector<1x16x128xf32> to vector<1xf32>
    %21 = vector.shape_cast %20 : vector<1xf32> to vector<1x1x1xf32>
    %22 = vector.extract %21[0, 0, 0] : f32 from vector<1x1x1xf32>
    %23 = arith.addf %17, %22 : f32
    %c0_18 = arith.constant 0 : index
    %24 = memref.load %arg5[%c0_18] : memref<2xf32, #tpu.memory_space<smem>>
    memref.store %23, %arg5[%c0_18] : memref<2xf32, #tpu.memory_space<smem>>
    %c1_19 = arith.constant 1 : index
    %25 = memref.load %arg5[%c1_19] : memref<2xf32, #tpu.memory_space<smem>>
    %26 = arith.mulf %16, %16 : vector<2x16x128xf32>
    %27 = vector.shape_cast %26 : vector<2x16x128xf32> to vector<1x2x16x128xf32>
    %cst_20 = arith.constant dense<0.000000e+00> : vector<1xf32>
    %28 = vector.multi_reduction <add>, %27, %cst_20 [1, 2, 3] : vector<1x2x16x128xf32> to vector<1xf32>
    %29 = vector.shape_cast %28 : vector<1xf32> to vector<1x1x1x1xf32>
    %30 = vector.extract %29[0, 0, 0, 0] : f32 from vector<1x1x1x1xf32>
    %31 = arith.addf %25, %30 : f32
    %c1_21 = arith.constant 1 : index
    %32 = memref.load %arg5[%c1_21] : memref<2xf32, #tpu.memory_space<smem>>
    memref.store %31, %arg5[%c1_21] : memref<2xf32, #tpu.memory_space<smem>>
    %c0_i32_22 = arith.constant 0 : i32
    %33 = arith.cmpi eq, %arg1, %c0_i32_22 : i32
    %34 = arith.extui %33 : i1 to i32
    %c0_i32_23 = arith.constant 0 : i32
    %35 = arith.cmpi ne, %34, %c0_i32_23 : i32
    scf.if %35 {
      %c0_24 = arith.constant 0 : index
      %36 = memref.load %arg5[%c0_24] : memref<2xf32, #tpu.memory_space<smem>>
      %cst_25 = arith.constant 1.22070313E-4 : f32
      %37 = arith.mulf %36, %cst_25 : f32
      %c1_26 = arith.constant 1 : index
      %38 = memref.load %arg5[%c1_26] : memref<2xf32, #tpu.memory_space<smem>>
      %cst_27 = arith.constant 2.44140625E-4 : f32
      %39 = arith.mulf %38, %cst_27 : f32
      %40 = arith.addf %37, %39 : f32
      %c0_28 = arith.constant 0 : index
      %c0_29 = arith.constant 0 : index
      %41 = memref.load %arg4[%c0_28, %c0_29] : memref<1x1xf32, #tpu.memory_space<smem>>
      memref.store %40, %arg4[%c0_28, %c0_29] : memref<1x1xf32, #tpu.memory_space<smem>>
    } else {
    }
    return
  }
  func.func @transform_0(%arg0: i32, %arg1: i32) -> (i32, i32, i32, i32) {
    %c1_i32 = arith.constant 1 : i32
    %0 = arith.muli %arg0, %c1_i32 : i32
    %1 = arith.addi %0, %arg1 : i32
    %c0_i32 = arith.constant 0 : i32
    %c0_i32_0 = arith.constant 0 : i32
    %c0_i32_1 = arith.constant 0 : i32
    %c0_i32_2 = arith.constant 0 : i32
    return %c0_i32, %c0_i32_0, %1, %c0_i32_1 : i32, i32, i32, i32
  }
  func.func @transform_1(%arg0: i32, %arg1: i32) -> (i32, i32, i32, i32) {
    %c1_i32 = arith.constant 1 : i32
    %0 = arith.muli %arg0, %c1_i32 : i32
    %1 = arith.addi %0, %arg1 : i32
    %c0_i32 = arith.constant 0 : i32
    %c0_i32_0 = arith.constant 0 : i32
    %c0_i32_1 = arith.constant 0 : i32
    %c0_i32_2 = arith.constant 0 : i32
    return %c0_i32, %c0_i32_0, %1, %c0_i32_1 : i32, i32, i32, i32
  }
  func.func @transform_2(%arg0: i32, %arg1: i32) -> (i32, i32) {
    %c0_i32 = arith.constant 0 : i32
    %c0_i32_0 = arith.constant 0 : i32
    return %arg0, %c0_i32 : i32, i32
  }
}

</mosaic_0001>

<bundles_post_ra>
// kernel: tpu_custom_call.1
= control target key start
LH: loop header
LB: loop body
LE: loop exit
PB: predicated region body
PF: predicated region fallthrough
CT: control target
= control target key end

     0   :  { %7 = vsyncpa [#allocation4], 0  ;;  %s291_s0 = inlined_call_operand.hbm [shape: f32[2,4,16,128], index: 0, kind: input, shape index: {}]   ;;  %s292_s1 = inlined_call_operand.hbm [shape: f32[2,4,16,128], index: 1, kind: input, shape index: {}]   ;;  %s293_s2 = inlined_call_operand.hbm [shape: f32[1,1], index: 2, kind: output, shape index: {}]  }
   0x1   :  { %8 = vsyncpa [#allocation7], 0 }
   0x2   :  { %9 = vsyncpa [#allocation5], 0 }
   0x3   :  { %s23_s9 = sld [smem:[#allocation0]]   ;;  %s250_s10 = smov [#allocation3]  }
   0x4   :  { %s31_s11 = sshll.u32 %s250_s10, 4  ;;  %s251_s12 = smov 1024   ;;  %s32_s11 = int_to_ptr.vmem [resolvable:$true] %s31_s11 }
   0x5   :  { %38 = sst [smem:[#allocation10]] %s251_s12  ;;  %s252_s13 = smov 512  }
   0x6   :  { %40 = sst [smem:[#allocation10 + $0x1]] %s252_s13  ;;  %s253_s14 = smov 4  }
   0x7   :  { %42 = sst [smem:[#allocation10 + $0x2]] %s253_s14  ;;  %s254_s16 = smov 128  }
   0x8   :  { %44 = sst [smem:[#allocation10 + $0x3]] %s254_s16  ;;  %s255_s18 = smov 8  }
   0x9   :  { %s209_s15 = sshll.u32 %s23_s9, 26  ;;  %46 = sst [smem:[#allocation10 + $0x4]] %s254_s16 }
   0xa   :  { %s210_s17 = sadd.s32 134217728, %s209_s15  ;;  %48 = sst [smem:[#allocation10 + $0x5]] %s255_s18 }
   0xb   :  { %s256_s19 = smov [#allocation4]   ;;  %s257_s20 = smov 131072  }
   0xc   :  { %50 = dma.general %s291_s0, 1024, %s32_s11, %s256_s19, %s257_s20, [#allocation10], %s210_s17, 0  }
   0xd   :  { %s64_s23 = sld [smem:[#allocation0]]   ;;  %s258_s24 = smov [#allocation6]  }
   0xe   :  { %s72_s25 = sshll.u32 %s258_s24, 4  ;;  %s259_s26 = smov 1024   ;;  %s73_s25 = int_to_ptr.vmem [resolvable:$true] %s72_s25 }
   0xf   :  { %79 = sst [smem:[#allocation12]] %s259_s26  ;;  %s260_s27 = smov 512  }
  0x10   :  { %81 = sst [smem:[#allocation12 + $0x1]] %s260_s27  ;;  %s261_s28 = smov 4  }
  0x11   :  { %83 = sst [smem:[#allocation12 + $0x2]] %s261_s28  ;;  %s262_s30 = smov 128  }
  0x12   :  { %85 = sst [smem:[#allocation12 + $0x3]] %s262_s30  ;;  %s263_s4 = smov 8  }
  0x13   :  { %s211_s29 = sshll.u32 %s64_s23, 26  ;;  %87 = sst [smem:[#allocation12 + $0x4]] %s262_s30 }
  0x14   :  { %s212_s3 = sadd.s32 134217728, %s211_s29  ;;  %89 = sst [smem:[#allocation12 + $0x5]] %s263_s4 }
  0x15   :  { %s264_s5 = smov [#allocation7]   ;;  %s265_s6 = smov 131072  }
  0x16   :  { %91 = dma.general %s292_s1, 1024, %s73_s25, %s264_s5, %s265_s6, [#allocation12], %s212_s3, 0  }
  0x17   :  { %244 = dma.done.wait [#allocation4], 1024  }
  0x18   :  { %245 = vsyncadd [#allocation4], 4294966272 }
  0x19   :  { %246 = dma.done.wait [#allocation7], 1024  }
  0x1a   :  { %247 = vsyncadd [#allocation7], 4294966272  ;;  %v115_v0 = vld [vmem:[#allocation3 + $0x10] sm:$0xff]  ;;  %v116_v1 = vld [vmem:[#allocation3 + $0x18] sm:$0xff]  ;;  %s266_s12 = smov [#allocation8]  }
  0x1b   :  { %v117_v2 = vld [vmem:[#allocation3 + $0x30] sm:$0xff]  ;;  %v118_v3 = vld [vmem:[#allocation3 + $0x38] sm:$0xff]  ;;  %v119_v4 = vld [vmem:[#allocation6] sm:$0xff] }
  0x1c   :  { %v120_v5 = vld [vmem:[#allocation6 + $0x8] sm:$0xff]  ;;  %v121_v6 = vld [vmem:[#allocation6 + $0x20] sm:$0xff]  ;;  %v124_v8 = vld [vmem:[#allocation6 + $0x10] sm:$0xff]  ;;  %v138_v9 = vmul.f32 %v119_v4, %v119_v4 }
  0x1d   :  { %v122_v7 = vld [vmem:[#allocation6 + $0x28] sm:$0xff]  ;;  %v139_v10 = vmul.f32 %v120_v5, %v120_v5  ;;  %v125_v11 = vld [vmem:[#allocation6 + $0x18] sm:$0xff]  ;;  %v126_v12 = vld [vmem:[#allocation6 + $0x30] sm:$0xff]  ;;  %v128_v14 = vsub.f32 %v115_v0, %v124_v8  ;;  %v140_v15 = vmul.f32 %v121_v6, %v121_v6 }
  0x1e   :  { %v127_v13 = vld [vmem:[#allocation6 + $0x38] sm:$0xff]  ;;  %v141_v16 = vmul.f32 %v122_v7, %v122_v7  ;;  %v129_v17 = vsub.f32 %v116_v1, %v125_v11  ;;  %v130_v18 = vsub.f32 %v117_v2, %v126_v12  ;;  %v110_v20 = vld [vmem:[#allocation3] sm:$0xff]  ;;  %v111_v21 = vld [vmem:[#allocation3 + $0x8] sm:$0xff] }
  0x1f   :  { %v131_v19 = vsub.f32 %v118_v3, %v127_v13  ;;  %v112_v22 = vld [vmem:[#allocation3 + $0x20] sm:$0xff]  ;;  %v132_v23 = vmul.f32 %v128_v14, %v128_v14  ;;  %v142_v24 = vadd.f32 %v140_v15, %v138_v9  ;;  %v113_v26 = vld [vmem:[#allocation3 + $0x28] sm:$0xff]  ;;  %v144_v27 = vsub.f32 %v110_v20, %v119_v4 }
  0x20   :  { %v143_v25 = vadd.f32 %v141_v16, %v139_v10  ;;  %v133_v28 = vmul.f32 %v129_v17, %v129_v17  ;;  %v134_v29 = vmul.f32 %v130_v18, %v130_v18  ;;  %v145_v31 = vsub.f32 %v111_v21, %v120_v5 }
  0x21   :  { %v135_v30 = vmul.f32 %v131_v19, %v131_v19  ;;  %v146_v32 = vsub.f32 %v112_v22, %v121_v6  ;;  %v147_v33 = vsub.f32 %v113_v26, %v122_v7  ;;  %v165_v34 = vmul.f32 %v144_v27, %v144_v27 }
  0x22   :  { %v136_v35 = vadd.f32 %v134_v29, %v132_v23  ;;  %v166_v37 = vmul.f32 %v145_v31, %v145_v31 }
  0x23   :  { %v137_v36 = vadd.f32 %v135_v30, %v133_v28  ;;  %v167_v38 = vmul.f32 %v146_v32, %v146_v32  ;;  %v168_v41 = vmul.f32 %v147_v33, %v147_v33 }
  0x24   :  { %v149_v39 = vmul.f32 %v142_v24, %v136_v35  ;;  %v169_v42 = vadd.f32 %v166_v37, %v165_v34 }
  0x25   :  { %v150_v40 = vmul.f32 %v143_v25, %v137_v36 }
  0x26   :  { %v170_v44 = vadd.f32 %v169_v42, %v167_v38 }
  0x27   :  { %v151_v43 = vadd.f32 %v150_v40, %v149_v39 }
  0x28   :  { %v171_v45 = vadd.f32 %v170_v44, %v168_v41 }
  0x29   :  { %152 = vadd.xlane.f32.xlu0 %v151_v43 }
  0x2d   :  { %172 = vadd.xlane.f32.xlu0 %v171_v45 }
  0xb2   :  { %v153_v46 = vpop.xlane.xlu0 %152 }
  0xb3   :  { %v154_v47 = vrot.slane %v153_v46, 4 }
  0xb5   :  { %v155_v48 = vadd.f32 %v154_v47, %v153_v46 }
  0xb6   :  { %v173_v49 = vpop.xlane.xlu0 %172 }
  0xb7   :  { %v156_v50 = vrot.slane %v155_v48, 2  ;;  %v174_v51 = vrot.slane %v173_v49, 4 }
  0xb9   :  { %v175_v52 = vadd.f32 %v174_v51, %v173_v49  ;;  %v157_v53 = vadd.f32 %v156_v50, %v155_v48 }
  0xbb   :  { %v176_v54 = vrot.slane %v175_v52, 2  ;;  %v158_v55 = vrot.slane %v157_v53, 1 }
  0xbd   :  { %v177_v56 = vadd.f32 %v176_v54, %v175_v52  ;;  %v159_v57 = vadd.f32 %v158_v55, %v157_v53 }
  0xbf   :  { %215 = vpush %v159_v57  ;;  %v178_v58 = vrot.slane %v177_v56, 1 }
  0xc1   :  { %v179_v59 = vadd.f32 %v178_v58, %v177_v56 }
  0xc3   :  { %217 = vpush %v179_v59 }
  0xf0   :  { %s216_s1 = spop %215 }
  0xf1   :  { %s188_s8 = smul.f32 0.00012207031, %s216_s1 }
  0xf4   :  { %s218_s9 = spop %217 }
  0xf5   :  { %s190_s10 = smul.f32 0.00024414063, %s218_s9 }
  0xf7   :  { %s191_s11 = sadd.f32 %s190_s10, %s188_s8 }
  0xf9   :  { %193 = sst [smem:[#allocation8]] %s191_s11 }
  0xfa   :  { %201 = dma.smem_to_hbm %s266_s12, 16, %s293_s2, [#allocation5]  }
  0xfb   :  { %248 = dma.done.wait [#allocation5], 16  }
  0xfc   :  { %249 = vsyncadd [#allocation5], 4294967280 }
  0xfd   :  { %205 = sfence }
  0xfe   :  { %206 = vsyncpa [#allocation4], 1 }
  0xff   :  { %207 = vsyncpa [#allocation7], 1 }
 0x100   :  { %208 = vsyncpa [#allocation5], 1 }

</bundles_post_ra>
